<compile_context>
chip_gen: v7x
topology: tpu7x:2x2x1
jax: 0.10.0
libtpu: 0.0.40
codegen_flags: <defaults>
</compile_context>

<pallas_src>
import jax
import jax.numpy as jnp
from jax.experimental import pallas as pl
from jax.experimental.pallas import tpu as pltpu

_LANE = 128
_TARGET_BLOCK_BYTES = 8 * 1024 * 1024  # ~8 MiB of input bytes per fast-path block


# ---------------------------------------------------------------------------
# Generation-aware chip / VMEM budgeting.
# ---------------------------------------------------------------------------
def _round_down(v, m):
    return (v // m) * m


def _round_up(v, m):
    return ((v + m - 1) // m) * m


def _sublane_multiple(dtype):
    # Packed-dtype sublane granularity: 8 for 4-byte, 16 for bf16/f16, 32 for int8/fp8.
    return max(8, 32 // max(1, jnp.dtype(dtype).itemsize))


def _chip_params():
    """Returns (vmem_capacity_bytes, num_tensorcores_per_chip)."""
    cap, num_tc = 64 * 1024 * 1024, 2  # conservative fallback = v7x
    try:
        cap = int(pltpu.get_tpu_info().vmem_capacity_bytes)
        # v7x: 64 MiB VMEM per TC and 2 TCs/chip.  v5e/v6e: 128 MiB, 1 TC/chip.
        num_tc = 2 if cap <= 64 * 1024 * 1024 else 1
    except Exception:
        pass
    return cap, num_tc


def _budgets(cap):
    tile_budget = int(cap * 0.45)                                 # resident-tile bytes
    vmem_limit = int(min(cap, max(32 * 1024 * 1024, cap * 0.75)))  # scoped limit w/ headroom
    return tile_budget, vmem_limit


def _softmax_cost(n_rows, n_cols, itemsize, extra_read_passes=0):
    nd = n_rows * n_cols
    return pl.CostEstimate(
        flops=5 * nd,
        transcendentals=nd,
        bytes_accessed=(2 + extra_read_passes) * nd * itemsize,
    )


# ---------------------------------------------------------------------------
# Tile selection.
# ---------------------------------------------------------------------------
def _select_fast_tile_d(n_rows, n_cols, dtype, tile_budget, num_tc):
    """Lane tile for the fast path (full-N column block resident in VMEM);
    None if even a 128-lane column block does not fit the budget."""
    itemsize = jnp.dtype(dtype).itemsize
    # Per-column VMEM: double-buffered input + double-buffered output + ~2 f32
    # full-block temporaries (for f32 input the .astype is a no-op; sub/exp fuse).
    per_col = n_rows * (4 * itemsize + 2 * 4)
    if n_cols <= _LANE:
        return n_cols if per_col * n_cols <= tile_budget else None
    td_budget = _round_down(tile_budget // per_col, _LANE)
    if td_budget < _LANE:
        return None
    # Size by bytes, not lane count: target ~8 MiB of input per block so the
    # ~0.35 us per-grid-step overhead is amortized (fewer, larger DMAs).
    td_target = _round_down(max(_TARGET_BLOCK_BYTES // (n_rows * itemsize), _LANE), _LANE)
    td = min(td_budget, td_target, _round_up(n_cols, _LANE))
    if num_tc == 2:
        # Dual-TensorCore (v7x): keep an even number of D grid steps so both
        # cores get equal work; force >= 2 steps when D allows it.  On 1-TC
        # chips (v5e/v6e) the grid is a serial loop, so no split is added.
        steps = pl.cdiv(n_cols, td)
        if steps == 1 and n_cols > _LANE:
            steps = 2
        elif steps > 1 and steps % 2 == 1:
            steps += 1
        td = max(_LANE, min(td, _round_up(pl.cdiv(n_cols, steps), _LANE)))
    return td


def _select_tall_tiles(n_rows, n_cols, dtype, tile_budget, num_tc):
    itemsize = jnp.dtype(dtype).itemsize
    sub = _sublane_multiple(dtype)
    # Wider caps on 128 MiB parts (v5e/v6e); tighter on 64 MiB v7x.
    td_cap = 512 if num_tc == 2 else 1024
    tn_cap = 1024 if num_tc == 2 else 2048
    if n_cols <= _LANE:
        td = n_cols
    else:
        td = min(td_cap, _round_up(n_cols, _LANE))
        if num_tc == 2:
            td = max(_LANE, min(td, _round_up(pl.cdiv(n_cols, 2), _LANE)))
    per_elem = 4 * itemsize + 2 * 4  # 2x in + 2x out buffers + ~2 f32 temps
    tn = _round_down(tile_budget // (td * per_elem), sub)
    tn = max(sub, min(tn, tn_cap, _round_up(n_rows, sub)))
    return tn, td


# ---------------------------------------------------------------------------
# Fast path: full-N column block resident, tiled over D only.
# ---------------------------------------------------------------------------
def _softmax_cols_kernel(x_ref, o_ref):
    # x_ref: (N, td) block; reduce over axis 0 (PyTorch dim=0).
    x = x_ref[...].astype(jnp.float32)
    x_max = jnp.max(x, axis=0, keepdims=True)
    x_exp = jnp.exp(x - x_max)
    denom = jnp.sum(x_exp, axis=0, keepdims=True)
    # One reciprocal per column + broadcast multiply instead of N divides.
    # NOTE: on a remainder D tile the out-of-bounds lanes may hold garbage
    # (possibly inf/NaN after exp); columns are independent (per-lane VPU ops)
    # and those lane stores are masked, so valid columns are never contaminated.
    o_ref[...] = (x_exp * pl.reciprocal(denom, approx=False)).astype(o_ref.dtype)


def _softmax_fast(x2, td, vmem_limit):
    n_rows, n_cols = x2.shape
    return pl.pallas_call(
        _softmax_cols_kernel,
        out_shape=jax.ShapeDtypeStruct((n_rows, n_cols), x2.dtype),
        grid_spec=pltpu.PrefetchScalarGridSpec(
            num_scalar_prefetch=0,
            grid=(pl.cdiv(n_cols, td),),
            in_specs=[pl.BlockSpec((n_rows, td), lambda j: (0, j))],
            out_specs=pl.BlockSpec((n_rows, td), lambda j: (0, j)),
        ),
        compiler_params=pltpu.CompilerParams(
            dimension_semantics=("parallel",),
            vmem_limit_bytes=vmem_limit,
        ),
        cost_estimate=_softmax_cost(n_rows, n_cols, jnp.dtype(x2.dtype).itemsize),
    )(x2)


# ---------------------------------------------------------------------------
# Tall path: two-pass online softmax (columns too tall for VMEM).
# ---------------------------------------------------------------------------
def _make_stats_kernel(n_rows, tn):
    rem = n_rows % tn

    def _update(x, m_ref, s_ref):
        m_old = m_ref[...]
        m_new = jnp.maximum(m_old, jnp.max(x, axis=0, keepdims=True))
        s_ref[...] = (s_ref[...] * jnp.exp(m_old - m_new)
                      + jnp.sum(jnp.exp(x - m_new), axis=0, keepdims=True))
        m_ref[...] = m_new

    def _stats_kernel(x_ref, m_ref, s_ref):
        k = pl.program_id(1)

        @pl.when(k == 0)
        def _():
            m_ref[...] = jnp.full_like(m_ref, -jnp.inf)
            s_ref[...] = jnp.zeros_like(s_ref)

        if rem == 0:
            _update(x_ref[...].astype(jnp.float32), m_ref, s_ref)
        else:
            last = pl.num_programs(1) - 1

            @pl.when(k != last)
            def _():
                # Steady-state tiles: no row masking (saves iota/cmp/select per elem).
                _update(x_ref[...].astype(jnp.float32), m_ref, s_ref)

            @pl.when(k == last)
            def _():
                # Only the final N tile carries padded rows; mask them to -inf so
                # they contribute nothing to the max (and exp(-inf - m) == 0).
                x = x_ref[...].astype(jnp.float32)
                row = jax.lax.broadcasted_iota(jnp.int32, x.shape, 0)
                _update(jnp.where(row < rem, x, -jnp.inf), m_ref, s_ref)

    return _stats_kernel


def _apply_kernel(x_ref, m_ref, s_ref, o_ref):
    x = x_ref[...].astype(jnp.float32)
    inv = pl.reciprocal(s_ref[...], approx=False)
    o_ref[...] = (jnp.exp(x - m_ref[...]) * inv).astype(o_ref.dtype)


def _softmax_two_pass(x2, tn, td, vmem_limit):
    """Online softmax along axis 0, tiled over both N (reduction) and D."""
    n_rows, n_cols = x2.shape
    gd, gn = pl.cdiv(n_cols, td), pl.cdiv(n_rows, tn)
    itemsize = jnp.dtype(x2.dtype).itemsize
    nd = n_rows * n_cols

    m, s = pl.pallas_call(
        _make_stats_kernel(n_rows, tn),
        out_shape=(jax.ShapeDtypeStruct((1, n_cols), jnp.float32),
                   jax.ShapeDtypeStruct((1, n_cols), jnp.float32)),
        grid_spec=pltpu.PrefetchScalarGridSpec(
            num_scalar_prefetch=0,
            grid=(gd, gn),  # reduction axis (N) last
            in_specs=[pl.BlockSpec((tn, td), lambda j, k: (k, j))],
            out_specs=[pl.BlockSpec((1, td), lambda j, k: (0, j)),
                       pl.BlockSpec((1, td), lambda j, k: (0, j))],
        ),
        compiler_params=pltpu.CompilerParams(
            dimension_semantics=("parallel", "arbitrary"),
            vmem_limit_bytes=vmem_limit,
        ),
        cost_estimate=pl.CostEstimate(
            flops=4 * nd, transcendentals=nd,
            bytes_accessed=nd * itemsize + 8 * n_cols),
    )(x2)

    return pl.pallas_call(
        _apply_kernel,
        out_shape=jax.ShapeDtypeStruct((n_rows, n_cols), x2.dtype),
        grid_spec=pltpu.PrefetchScalarGridSpec(
            num_scalar_prefetch=0,
            grid=(gd, gn),
            in_specs=[pl.BlockSpec((tn, td), lambda j, k: (k, j)),
                      pl.BlockSpec((1, td), lambda j, k: (0, j)),
                      pl.BlockSpec((1, td), lambda j, k: (0, j))],
            out_specs=pl.BlockSpec((tn, td), lambda j, k: (k, j)),
        ),
        compiler_params=pltpu.CompilerParams(
            dimension_semantics=("parallel", "parallel"),
            vmem_limit_bytes=vmem_limit,
        ),
        cost_estimate=pl.CostEstimate(
            flops=3 * nd, transcendentals=nd,
            bytes_accessed=2 * nd * itemsize + 8 * n_cols),
    )(x2, m, s)


# ---------------------------------------------------------------------------
# 1-D special case: padded (ceil(N/128), 128) layout — full vregs, two-stage reduce.
# ---------------------------------------------------------------------------
def _softmax_vec_kernel(x_ref, o_ref):
    # Softmax over ALL elements of the padded (rows, 128) block: sublane reduce
    # on the VPU, then the final cross-lane reduce on the XLU.
    x = x_ref[...].astype(jnp.float32)
    x_max = jnp.max(x)
    x_exp = jnp.exp(x - x_max)
    denom = jnp.sum(x_exp)
    o_ref[...] = (x_exp * pl.reciprocal(denom, approx=False)).astype(o_ref.dtype)


def _softmax_1d(x, tile_budget, vmem_limit):
    n = x.shape[0]
    rows = pl.cdiv(n, _LANE)
    padded = rows * _LANE
    itemsize = jnp.dtype(x.dtype).itemsize
    if padded * (4 * itemsize + 2 * 4) > tile_budget:
        # TODO(synk): pathological huge 1-D vectors fall back to the general
        # (N, 1) column layout (correct, but 1-lane utilization).
        return None
    # Pad with -inf so padded elements contribute exp(-inf) == 0 to the sum.
    xp = x if padded == n else jnp.pad(x, (0, padded - n), constant_values=-jnp.inf)
    out = pl.pallas_call(
        _softmax_vec_kernel,
        out_shape=jax.ShapeDtypeStruct((rows, _LANE), x.dtype),
        compiler_params=pltpu.CompilerParams(vmem_limit_bytes=vmem_limit),
        cost_estimate=_softmax_cost(rows, _LANE, itemsize),
    )(xp.reshape(rows, _LANE))
    return out.reshape(padded)[:n]


# ---------------------------------------------------------------------------
# Public wrapper (matches SoftmaxStable.forward: softmax along dim=0).
# ---------------------------------------------------------------------------
def softmax_stable(x):
    orig_shape = x.shape
    if x.ndim == 0:
        raise ValueError("softmax_stable requires at least 1 dimension")

    cap, num_tc = _chip_params()
    tile_budget, vmem_limit = _budgets(cap)

    if x.ndim == 1:
        out = _softmax_1d(x, tile_budget, vmem_limit)
        if out is not None:
            return out.reshape(orig_shape)
        x2 = x.reshape(x.shape[0], 1)  # rare fallback for huge 1-D vectors
    else:
        # Collapse trailing dims: softmax over dim 0 acts per trailing-index column.
        x2 = x.reshape(x.shape[0], -1)

    n_rows, n_cols = x2.shape
    td = _select_fast_tile_d(n_rows, n_cols, x2.dtype, tile_budget, num_tc)
    if td is not None:
        out = _softmax_fast(x2, td, vmem_limit)
    else:
        tn, td = _select_tall_tiles(n_rows, n_cols, x2.dtype, tile_budget, num_tc)
        out = _softmax_two_pass(x2, tn, td, vmem_limit)
    return out.reshape(orig_shape)


# ---------------------------------------------------------------------------
# Self-test
# ---------------------------------------------------------------------------
def _reference(x):
    x = x.astype(jnp.float32)
    x_max = jnp.max(x, axis=0, keepdims=True)
    x_exp = jnp.exp(x - x_max)
    return x_exp / jnp.sum(x_exp, axis=0, keepdims=True)


if __name__ == "__main__":
    key = jax.random.PRNGKey(0)
    k0, k1, k2, k3 = jax.random.split(key, 4)
    _cap, _ = _chip_params()
    _, _vlim = _budgets(_cap)

    # Main case: softmax over dim=0 of a small (seq=8, hidden=32) tensor.
    x = jax.random.normal(k0, (8, 32), dtype=jnp.float32)
    y = jax.block_until_ready(softmax_stable(x))
    assert y.shape == x.shape and y.dtype == x.dtype
    assert jnp.allclose(y, _reference(x), atol=1e-6, rtol=1e-6)
    assert jnp.allclose(jnp.sum(y, axis=0), jnp.ones((x.shape[1],)), atol=1e-5)

    # D > 128 and not a multiple of 128: exercises cdiv remainder lane tiling.
    xb = jax.random.normal(k1, (16, 300), dtype=jnp.float32)
    yb = jax.block_until_ready(softmax_stable(xb))
    assert jnp.allclose(yb, _reference(xb), atol=1e-6, rtol=1e-6)

    # 3-D input (batch=2, channels=4, hidden=16): trailing dims are collapsed.
    xc = jax.random.normal(k2, (2, 4, 16), dtype=jnp.float32)
    yc = jax.block_until_ready(softmax_stable(xc))
    assert jnp.allclose(yc, _reference(xc), atol=1e-6, rtol=1e-6)

    # 1-D inputs: lane-dense padded (rows, 128) layout, incl. N % 128 != 0.
    xd = jax.random.normal(k3, (32,), dtype=jnp.float32)
    yd = jax.block_until_ready(softmax_stable(xd))
    assert jnp.allclose(yd, _reference(xd), atol=1e-6, rtol=1e-6)
    xd2 = jax.random.normal(k3, (300,), dtype=jnp.float32)
    yd2 = jax.block_until_ready(softmax_stable(xd2))
    assert jnp.allclose(yd2, _reference(xd2), atol=1e-6, rtol=1e-6)

    # Tall-N online-softmax path, forced at a small shape with tiny tiles so
    # that multi-step accumulation and the masked remainder rows are exercised.
    xe = jax.random.normal(k0, (20, 300), dtype=jnp.float32)
    ye = jax.block_until_ready(_softmax_two_pass(xe, tn=8, td=128, vmem_limit=_vlim))
    assert jnp.allclose(ye, _reference(xe), atol=1e-5, rtol=1e-5)

    # bf16 tall path with the packed sublane granularity (tn multiple of 16).
    xf = jax.random.normal(k1, (20, 300), dtype=jnp.bfloat16)
    yf = jax.block_until_ready(_softmax_two_pass(xf, tn=16, td=128, vmem_limit=_vlim))
    assert jnp.allclose(yf.astype(jnp.float32), _reference(xf), atol=2e-2, rtol=2e-2)

    print("KERNEL_OK")
</pallas_src>

<mosaic_0001>
module attributes {stable_mosaic.version = 11 : i64} {
  func.func @_softmax_cols_kernel(%arg0: i32, %arg1: memref<8x32xf32, #tpu.memory_space<vmem>>, %arg2: memref<8x32xf32, #tpu.memory_space<vmem>>) attributes {dimension_semantics = [#tpu.dimension_semantics<parallel>], iteration_bounds = array<i64: 1>, scalar_prefetch = 0 : i64, scratch_operands = 0 : i64, tpu.core_type = #tpu.core_type<tc>, window_params = [{transform_indices = @transform_0, window_bounds = array<i64: 8, 32>}, {transform_indices = @transform_1, window_bounds = array<i64: 8, 32>}]} {
    %c0 = arith.constant 0 : index
    %c0_0 = arith.constant 0 : index
    %0 = vector.load %arg1[%c0, %c0_0] : memref<8x32xf32, #tpu.memory_space<vmem>>, vector<8x32xf32>
    %cst = arith.constant dense<0xFF800000> : vector<32xf32>
    %1 = vector.multi_reduction <maximumf>, %0, %cst [0] : vector<8x32xf32> to vector<32xf32>
    %2 = vector.shape_cast %1 : vector<32xf32> to vector<1x32xf32>
    %3 = vector.broadcast %2 : vector<1x32xf32> to vector<8x32xf32>
    %4 = arith.subf %0, %3 : vector<8x32xf32>
    %5 = math.exp %4 : vector<8x32xf32>
    %cst_1 = arith.constant dense<0.000000e+00> : vector<32xf32>
    %6 = vector.multi_reduction <add>, %5, %cst_1 [0] : vector<8x32xf32> to vector<32xf32>
    %7 = vector.shape_cast %6 : vector<32xf32> to vector<1x32xf32>
    %8 = tpu.reciprocal %7 : vector<1x32xf32> -> vector<1x32xf32>
    %9 = vector.broadcast %8 : vector<1x32xf32> to vector<8x32xf32>
    %10 = arith.mulf %5, %9 : vector<8x32xf32>
    %c0_2 = arith.constant 0 : index
    %c0_3 = arith.constant 0 : index
    %11 = vector.load %arg2[%c0_2, %c0_3] : memref<8x32xf32, #tpu.memory_space<vmem>>, vector<8x32xf32>
    tpu.vector_store %arg2[%c0_2, %c0_3], %10 {strides = array<i32>} : memref<8x32xf32, #tpu.memory_space<vmem>>, vector<8x32xf32>,
    return
  }
  func.func @transform_0(%arg0: i32) -> (i32, i32) {
    %c0_i32 = arith.constant 0 : i32
    %c0_i32_0 = arith.constant 0 : i32
    return %c0_i32, %arg0 : i32, i32
  }
  func.func @transform_1(%arg0: i32) -> (i32, i32) {
    %c0_i32 = arith.constant 0 : i32
    %c0_i32_0 = arith.constant 0 : i32
    return %c0_i32, %arg0 : i32, i32
  }
}

</mosaic_0001>

<bundles_post_ra>
// kernel: tpu_custom_call.1
= control target key start
LH: loop header
LB: loop body
LE: loop exit
PB: predicated region body
PF: predicated region fallthrough
CT: control target
= control target key end

     0   :  { %6 = vsyncpa [#allocation3], 0  ;;  %s151_s0 = inlined_call_operand.hbm [shape: f32[8,32], index: 0, kind: input, shape index: {}]   ;;  %s152_s1 = inlined_call_operand.hbm [shape: f32[8,32], index: 1, kind: output, shape index: {}]  }
   0x1   :  { %7 = vsyncpa [#allocation4], 0  ;;  %s112_s6 = smov [#allocation2]   ;;  %s64_s10 = scalar_lea.hbm %s151_s0, 128 }
   0x2   :  { %s14_s7 = sshll.u32 %s112_s6, 4  ;;  %p65_p0 = scmp.ne.s32.totalorder %s151_s0, %s64_s10  ;;  %s15_s7 = int_to_ptr.vmem [resolvable:$true] %s14_s7 }
   0x3   :  { %p68_p1 = scmp.lt.u32.totalorder %s64_s10, %s151_s0 }
   0x5   :  { %p70_p2 = pnand %p68_p1, %p65_p0 }
   0x7   :  { %73 = shalt.err (!%p70_p2)
}
   0x8   :  { %s74_s15 = scalar_lea.vmem %s15_s7, 128  ;;  %p79_p4 = scmp.lt.s32.totalorder %s15_s7, %s15_s7 }
   0x9   :  { %p75_p3 = scmp.ne.s32.totalorder %s15_s7, %s74_s15  ;;  %p80_p5 = scmp.lt.s32.totalorder %s74_s15, %s74_s15 }
   0xb   :  { %p81_p6 = por %p80_p5, %p79_p4 }
   0xd   :  { %p82_p7 = pnand %p81_p6, %p75_p3 }
   0xf   :  { %85 = shalt.err (!%p82_p7)
}
  0x10   :  { %17 = dma.hbm_to_vmem [thread:$0]  %s151_s0, 128, %s15_s7, [#allocation3]  }
  0x11   :  { %108 = dma.done.wait [#allocation3], 128  }
  0x12   :  { %109 = vsyncadd [#allocation3], 4294967168  ;;  %vm22_vm0 = vcmask 261120   ;;  %v21_v0 = vld [vmem:[#allocation2] sm:$0xff]  ;;  %s113_s0 = smov [#allocation5]  }
  0x13   :  { %v23_v1 = vsel %vm22_vm0, %v21_v0, -inf  ;;  %s49_s18 = sshll.u32 %s113_s0, 4  ;;  %s50_s18 = int_to_ptr.vmem [resolvable:$true] %s49_s18 }
  0x14   :  { %v24_v2 = vrot.slane %v23_v1, 4  ;;  %s86_s19 = scalar_lea.vmem %s50_s18, 128  ;;  %p91_p9 = scmp.lt.s32.totalorder %s50_s18, %s50_s18 }
  0x15   :  { %p87_p8 = scmp.ne.s32.totalorder %s50_s18, %s86_s19  ;;  %p92_p10 = scmp.lt.s32.totalorder %s86_s19, %s86_s19 }
  0x16   :  { %v25_v3 = vmax.f32 %v23_v1, %v24_v2 }
  0x17   :  { %p93_p11 = por %p92_p10, %p91_p9 }
  0x18   :  { %v26_v4 = vrot.slane %v25_v3, 2 }
  0x19   :  { %p94_p12 = pnand %p93_p11, %p87_p8 }
  0x1a   :  { %v27_v5 = vmax.f32 %v25_v3, %v26_v4 }
  0x1c   :  { %v28_v6 = vrot.slane %v27_v5, 1 }
  0x1e   :  { %v29_v7 = vmax.f32 %v27_v5, %v28_v6 }
  0x20   :  { %v30_v8 = vsub.f32 %v21_v0, %v29_v7 }
  0x22   :  { %v31_v9 = vmul.f32 1.442695, %v30_v8 }
  0x24   :  { %60 = vpow2.f32 %v31_v9 }
  0x2e   :  { %v61_v10 = vpop.eup %60 }
  0x2f   :  { %v33_v11 = vsel %vm22_vm0, %v61_v10, 0.0 }
  0x30   :  { %v34_v12 = vrot.slane %v33_v11, 4 }
  0x32   :  { %v35_v13 = vadd.f32 %v34_v12, %v33_v11 }
  0x34   :  { %v36_v14 = vrot.slane %v35_v13, 2 }
  0x36   :  { %v37_v15 = vadd.f32 %v36_v14, %v35_v13 }
  0x38   :  { %v38_v16 = vrot.slane %v37_v15, 1 }
  0x3a   :  { %v39_v17 = vadd.f32 %v38_v16, %v37_v15 }
  0x3c   :  { %62 = vrcp.f32 %v39_v17 }
  0x46   :  { %v63_v18 = vpop.eup %62 }
  0x47   :  { %v41_v19 = vmul.f32 %v63_v18, %v61_v10 }
  0x49   :  { %42 = vst.msk [vmem:[#allocation5] sm:$0xff] %vm22_vm0, %v41_v19 }
  0x4a   :  { %97 = shalt.err (!%p94_p12)
}
  0x4b   :  { %s98_s22 = scalar_lea.hbm %s152_s1, 128 }
  0x4c   :  { %p99_p13 = scmp.ne.s32.totalorder %s152_s1, %s98_s22  ;;  %p102_p0 = scmp.lt.u32.totalorder %s98_s22, %s152_s1 }
  0x4e   :  { %p104_p1 = pnand %p102_p0, %p99_p13 }
  0x50   :  { %107 = shalt.err (!%p104_p1)
}
  0x51   :  { %52 = dma.vmem_to_hbm [thread:$0]  %s50_s18, 128, %s152_s1, [#allocation4]  }
  0x52   :  { %110 = dma.done.wait [#allocation4], 128  }
  0x53   :  { %111 = vsyncadd [#allocation4], 4294967168 }
  0x54   :  { %56 = vsyncpa [#allocation3], 1 }
  0x55   :  { %57 = vsyncpa [#allocation4], 1 }

</bundles_post_ra>
